<compile_context>
chip_gen: v6e
topology: v6e:2x2x1
jax: 0.10.0
libtpu: 0.0.40
codegen_flags: <defaults>
</compile_context>

<pallas_src>
import functools

import jax
import jax.numpy as jnp
from jax.experimental import pallas as pl
from jax.experimental.pallas import tpu as pltpu


def _patch_embed_kernel(xt_ref, w_ref, mge_ref, meg_ref, gamma_ref, beta_ref,
                        o_ref, *, inv_count, eps):
    """One batch sample per grid step.

    xt_ref:    (1, K, P)  patch pixels; K = C*ph*pw ((c,kh,kw)-major rows),
                          P = num_patches on the lane axis
    w_ref:     (E, K)     conv weight (bf16 or f32)
    mge_ref:   (G, E)     group indicator  (1 iff channel e belongs to group g)
    meg_ref:   (E, G)     its transpose (broadcast group stat -> channel)
    gamma_ref: (E, 1), beta_ref: (E, 1)   GroupNorm affine params (f32)
    o_ref:     (1, E, P)  output block; (B, E, P) reshapes to NCHW for free
    """
    xt = xt_ref[0]                                         # (K, P)

    # Conv-as-matmul on the MXU: (E, K) @ (K, P) -> (E, P), f32 accumulation.
    y = jnp.dot(w_ref[...], xt, preferred_element_type=jnp.float32)   # (E, P)

    # ---------------- GroupNorm (per sample), two-pass, all f32 --------------
    # Pass 1: per-group mean.  Per-channel sums are a lane (XLU) reduction;
    # group reduce / broadcast-back use skinny factored-indicator matmuls.
    csum = jnp.sum(y, axis=1, keepdims=True)               # (E, 1)
    gsum = jnp.dot(mge_ref[...], csum,
                   preferred_element_type=jnp.float32)     # (G, 1)
    gmean = gsum * inv_count                               # (G, 1)
    mean_c = jnp.dot(meg_ref[...], gmean,
                     preferred_element_type=jnp.float32)   # (E, 1)

    # Pass 2: variance of centred values (avoids E[y^2]-mean^2 cancellation).
    d = y - mean_c                                         # (E, P)
    csq = jnp.sum(d * d, axis=1, keepdims=True)            # (E, 1)
    gsq = jnp.dot(mge_ref[...], csq,
                  preferred_element_type=jnp.float32)      # (G, 1)
    ginv = jax.lax.rsqrt(gsq * inv_count + eps)            # (G, 1)
    inv_c = jnp.dot(meg_ref[...], ginv,
                    preferred_element_type=jnp.float32)    # (E, 1)

    o_ref[0] = (d * inv_c * gamma_ref[...] + beta_ref[...]).astype(o_ref.dtype)


def patch_embedding(x, conv_w, gamma, beta, *, patch_size, num_groups,
                    eps=1e-5, mxu_dtype=jnp.bfloat16):
    """x: (B, C, H, W) NCHW.  Returns (B, E, H/ph, W/pw) NCHW (like PyTorch)."""
    B, C, H, W = x.shape
    ph, pw = patch_size
    assert H % ph == 0 and W % pw == 0
    Hp, Wp = H // ph, W // pw
    P = Hp * Wp
    E = conv_w.shape[0]
    K = C * ph * pw
    G = num_groups
    assert E % G == 0
    cpg = E // G

    # Patch extraction: the (Wp, pw) lane untangling is not expressible as a
    # rectangular BlockSpec, so it is a single fused XLA transpose producing
    # the per-sample (K, P) matrix the kernel consumes directly.  The matmul
    # inputs are cast to `mxu_dtype` (bf16 by default -> native MXU dtype and
    # half the patch DMA traffic); GroupNorm math stays f32 inside the kernel.
    xt = x.reshape(B, C, Hp, ph, Wp, pw).transpose(0, 1, 3, 5, 2, 4)
    xt = xt.reshape(B, K, P).astype(mxu_dtype)
    w_mat = conv_w.reshape(E, K).astype(mxu_dtype)         # (E, K)

    gamma_col = gamma.reshape(E, 1).astype(jnp.float32)
    beta_col = beta.reshape(E, 1).astype(jnp.float32)

    # Factored group indicators: (G, E) and (E, G) instead of a dense (E, E).
    ch_group = jnp.arange(E) // cpg
    mge = (jnp.arange(G)[:, None] == ch_group[None, :]).astype(jnp.float32)
    meg = mge.T

    kernel = functools.partial(_patch_embed_kernel,
                               inv_count=1.0 / float(P * cpg), eps=float(eps))

    out = pl.pallas_call(
        kernel,
        out_shape=jax.ShapeDtypeStruct((B, E, P), jnp.float32),
        grid_spec=pltpu.PrefetchScalarGridSpec(
            num_scalar_prefetch=0,
            grid=(B,),                                     # per-sample GroupNorm
            in_specs=[
                pl.BlockSpec((1, K, P), lambda b: (b, 0, 0)),   # patches^T
                pl.BlockSpec((E, K), lambda b: (0, 0)),          # conv weight
                pl.BlockSpec((G, E), lambda b: (0, 0)),          # group mask G->E
                pl.BlockSpec((E, G), lambda b: (0, 0)),          # group mask E->G
                pl.BlockSpec((E, 1), lambda b: (0, 0)),          # gamma
                pl.BlockSpec((E, 1), lambda b: (0, 0)),          # beta
            ],
            out_specs=pl.BlockSpec((1, E, P), lambda b: (b, 0, 0)),
        ),
        compiler_params=pltpu.CompilerParams(
            dimension_semantics=("parallel",),             # megacore over batch
            vmem_limit_bytes=32 * 1024 * 1024),            # explicit VMEM budget
    )(xt, w_mat, mge, meg, gamma_col, beta_col)

    # (B, E, P) -> (B, E, Hp, Wp): pure view, no HBM shuffle.
    return out.reshape(B, E, Hp, Wp)


def _reference(x, conv_w, gamma, beta, *, patch_size, num_groups, eps=1e-5):
    """Pure-JAX reference (strided conv, bias=False, + GroupNorm)."""
    y = jax.lax.conv_general_dilated(
        x, conv_w, window_strides=patch_size, padding="VALID",
        dimension_numbers=("NCHW", "OIHW", "NCHW"))
    B, E, Hp, Wp = y.shape
    g = num_groups
    yg = y.reshape(B, g, E // g, Hp, Wp)
    mean = yg.mean(axis=(2, 3, 4), keepdims=True)
    var = ((yg - mean) ** 2).mean(axis=(2, 3, 4), keepdims=True)
    yn = ((yg - mean) / jnp.sqrt(var + eps)).reshape(B, E, Hp, Wp)
    return yn * gamma.reshape(1, -1, 1, 1) + beta.reshape(1, -1, 1, 1)


if __name__ == "__main__":
    # Small shapes consistent with the module:
    #   in_channels=4, embed_dim=32, in_resolution=(16,16),
    #   patch_size=(4,4), num_groups=8   (embed_dim % num_groups == 0)
    B, C, H, W = 2, 4, 16, 16
    E = 32
    patch = (4, 4)
    groups = 8

    key = jax.random.PRNGKey(0)
    kx, kw, kg, kb = jax.random.split(key, 4)
    x = jax.random.normal(kx, (B, C, H, W), dtype=jnp.float32)
    conv_w = jax.random.normal(kw, (E, C, patch[0], patch[1]),
                               dtype=jnp.float32) * 0.1
    gamma = 1.0 + 0.1 * jax.random.normal(kg, (E,), dtype=jnp.float32)
    beta = 0.1 * jax.random.normal(kb, (E,), dtype=jnp.float32)

    ref = _reference(x, conv_w, gamma, beta, patch_size=patch,
                     num_groups=groups)

    # f32 MXU path: bit-for-bit semantics check at tight tolerance.
    out_f32 = patch_embedding(x, conv_w, gamma, beta, patch_size=patch,
                              num_groups=groups, mxu_dtype=jnp.float32)
    out_f32 = jax.block_until_ready(out_f32)
    assert out_f32.shape == (B, E, H // patch[0], W // patch[1])
    assert jnp.allclose(out_f32, ref, atol=1e-4, rtol=1e-4)

    # bf16 MXU path (default / perf-recommended): looser tolerance accounts for
    # bf16 matmul inputs; all GroupNorm statistics are still f32.
    out = patch_embedding(x, conv_w, gamma, beta, patch_size=patch,
                          num_groups=groups, mxu_dtype=jnp.bfloat16)
    out = jax.block_until_ready(out)
    assert out.shape == (B, E, H // patch[0], W // patch[1])
    assert jnp.allclose(out, ref, atol=3e-2, rtol=3e-2)

    print("KERNEL_OK")
</pallas_src>

<mosaic_0001>
module attributes {stable_mosaic.version = 11 : i64} {
  func.func @_patch_embed_kernel(%arg0: i32, %arg1: memref<1x64x16xf32, #tpu.memory_space<vmem>>, %arg2: memref<32x64xf32, #tpu.memory_space<vmem>>, %arg3: memref<8x32xf32, #tpu.memory_space<vmem>>, %arg4: memref<32x8xf32, #tpu.memory_space<vmem>>, %arg5: memref<32x1xf32, #tpu.memory_space<vmem>>, %arg6: memref<32x1xf32, #tpu.memory_space<vmem>>, %arg7: memref<1x32x16xf32, #tpu.memory_space<vmem>>) attributes {dimension_semantics = [#tpu.dimension_semantics<parallel>], iteration_bounds = array<i64: 2>, scalar_prefetch = 0 : i64, scratch_operands = 0 : i64, tpu.core_type = #tpu.core_type<tc>, window_params = [{transform_indices = @transform_0, window_bounds = array<i64: 1, 64, 16>}, {pipeline_mode = #tpu.pipeline_mode<synchronous>, transform_indices = @transform_1, window_bounds = array<i64: 32, 64>}, {pipeline_mode = #tpu.pipeline_mode<synchronous>, transform_indices = @transform_2, window_bounds = array<i64: 8, 32>}, {pipeline_mode = #tpu.pipeline_mode<synchronous>, transform_indices = @transform_3, window_bounds = array<i64: 32, 8>}, {pipeline_mode = #tpu.pipeline_mode<synchronous>, transform_indices = @transform_4, window_bounds = array<i64: 32, 1>}, {pipeline_mode = #tpu.pipeline_mode<synchronous>, transform_indices = @transform_5, window_bounds = array<i64: 32, 1>}, {transform_indices = @transform_6, window_bounds = array<i64: 1, 32, 16>}]} {
    %c0 = arith.constant 0 : index
    %c0_0 = arith.constant 0 : index
    %c0_1 = arith.constant 0 : index
    %0 = vector.load %arg1[%c0, %c0_0, %c0_1] : memref<1x64x16xf32, #tpu.memory_space<vmem>>, vector<1x64x16xf32>
    %1 = vector.shape_cast %0 : vector<1x64x16xf32> to vector<64x16xf32>
    %c0_2 = arith.constant 0 : index
    %c0_3 = arith.constant 0 : index
    %2 = vector.load %arg2[%c0_2, %c0_3] : memref<32x64xf32, #tpu.memory_space<vmem>>, vector<32x64xf32>
    %cst = arith.constant dense<0.000000e+00> : vector<32x16xf32>
    %3 = tpu.matmul %2, %1, %cst {dimension_numbers = #tpu.dot_dimension_numbers<[1], [0], [0], [1], [0, 0, 1, 1], [], []>} : vector<32x64xf32>, vector<64x16xf32>, vector<32x16xf32> -> vector<32x16xf32>
    %cst_4 = arith.constant dense<0.000000e+00> : vector<32xf32>
    %4 = vector.multi_reduction <add>, %3, %cst_4 [1] : vector<32x16xf32> to vector<32xf32>
    %5 = vector.shape_cast %4 : vector<32xf32> to vector<32x1xf32>
    %c0_5 = arith.constant 0 : index
    %c0_6 = arith.constant 0 : index
    %6 = vector.load %arg3[%c0_5, %c0_6] : memref<8x32xf32, #tpu.memory_space<vmem>>, vector<8x32xf32>
    %cst_7 = arith.constant dense<0.000000e+00> : vector<8x1xf32>
    %7 = tpu.matmul %6, %5, %cst_7 {dimension_numbers = #tpu.dot_dimension_numbers<[1], [0], [0], [1], [0, 0, 1, 1], [], []>} : vector<8x32xf32>, vector<32x1xf32>, vector<8x1xf32> -> vector<8x1xf32>
    %cst_8 = arith.constant 1.562500e-02 : f32
    %8 = vector.broadcast %cst_8 : f32 to vector<8x1xf32>
    %9 = arith.mulf %7, %8 : vector<8x1xf32>
    %c0_9 = arith.constant 0 : index
    %c0_10 = arith.constant 0 : index
    %10 = vector.load %arg4[%c0_9, %c0_10] : memref<32x8xf32, #tpu.memory_space<vmem>>, vector<32x8xf32>
    %cst_11 = arith.constant dense<0.000000e+00> : vector<32x1xf32>
    %11 = tpu.matmul %10, %9, %cst_11 {dimension_numbers = #tpu.dot_dimension_numbers<[1], [0], [0], [1], [0, 0, 1, 1], [], []>} : vector<32x8xf32>, vector<8x1xf32>, vector<32x1xf32> -> vector<32x1xf32>
    %12 = vector.broadcast %11 : vector<32x1xf32> to vector<32x16xf32>
    %13 = arith.subf %3, %12 : vector<32x16xf32>
    %14 = arith.mulf %13, %13 : vector<32x16xf32>
    %cst_12 = arith.constant dense<0.000000e+00> : vector<32xf32>
    %15 = vector.multi_reduction <add>, %14, %cst_12 [1] : vector<32x16xf32> to vector<32xf32>
    %16 = vector.shape_cast %15 : vector<32xf32> to vector<32x1xf32>
    %c0_13 = arith.constant 0 : index
    %c0_14 = arith.constant 0 : index
    %17 = vector.load %arg3[%c0_13, %c0_14] : memref<8x32xf32, #tpu.memory_space<vmem>>, vector<8x32xf32>
    %cst_15 = arith.constant dense<0.000000e+00> : vector<8x1xf32>
    %18 = tpu.matmul %17, %16, %cst_15 {dimension_numbers = #tpu.dot_dimension_numbers<[1], [0], [0], [1], [0, 0, 1, 1], [], []>} : vector<8x32xf32>, vector<32x1xf32>, vector<8x1xf32> -> vector<8x1xf32>
    %cst_16 = arith.constant 1.562500e-02 : f32
    %19 = vector.broadcast %cst_16 : f32 to vector<8x1xf32>
    %20 = arith.mulf %18, %19 : vector<8x1xf32>
    %cst_17 = arith.constant 9.99999974E-6 : f32
    %21 = vector.broadcast %cst_17 : f32 to vector<8x1xf32>
    %22 = arith.addf %20, %21 : vector<8x1xf32>
    %23 = math.rsqrt %22 : vector<8x1xf32>
    %c0_18 = arith.constant 0 : index
    %c0_19 = arith.constant 0 : index
    %24 = vector.load %arg4[%c0_18, %c0_19] : memref<32x8xf32, #tpu.memory_space<vmem>>, vector<32x8xf32>
    %cst_20 = arith.constant dense<0.000000e+00> : vector<32x1xf32>
    %25 = tpu.matmul %24, %23, %cst_20 {dimension_numbers = #tpu.dot_dimension_numbers<[1], [0], [0], [1], [0, 0, 1, 1], [], []>} : vector<32x8xf32>, vector<8x1xf32>, vector<32x1xf32> -> vector<32x1xf32>
    %26 = vector.broadcast %25 : vector<32x1xf32> to vector<32x16xf32>
    %27 = arith.mulf %13, %26 : vector<32x16xf32>
    %c0_21 = arith.constant 0 : index
    %c0_22 = arith.constant 0 : index
    %28 = vector.load %arg5[%c0_21, %c0_22] : memref<32x1xf32, #tpu.memory_space<vmem>>, vector<32x1xf32>
    %29 = vector.broadcast %28 : vector<32x1xf32> to vector<32x16xf32>
    %30 = arith.mulf %27, %29 : vector<32x16xf32>
    %c0_23 = arith.constant 0 : index
    %c0_24 = arith.constant 0 : index
    %31 = vector.load %arg6[%c0_23, %c0_24] : memref<32x1xf32, #tpu.memory_space<vmem>>, vector<32x1xf32>
    %32 = vector.broadcast %31 : vector<32x1xf32> to vector<32x16xf32>
    %33 = arith.addf %30, %32 : vector<32x16xf32>
    %c0_25 = arith.constant 0 : index
    %c0_26 = arith.constant 0 : index
    %c0_27 = arith.constant 0 : index
    %34 = vector.load %arg7[%c0_25, %c0_26, %c0_27] : memref<1x32x16xf32, #tpu.memory_space<vmem>>, vector<1x32x16xf32>
    %35 = vector.shape_cast %34 : vector<1x32x16xf32> to vector<32x16xf32>
    %36 = vector.shape_cast %33 : vector<32x16xf32> to vector<1x32x16xf32>
    tpu.vector_store %arg7[%c0_25, %c0_26, %c0_27], %36 {strides = array<i32>} : memref<1x32x16xf32, #tpu.memory_space<vmem>>, vector<1x32x16xf32>,
    return
  }
  func.func @transform_0(%arg0: i32) -> (i32, i32, i32) {
    %c0_i32 = arith.constant 0 : i32
    %c0_i32_0 = arith.constant 0 : i32
    %c0_i32_1 = arith.constant 0 : i32
    return %arg0, %c0_i32, %c0_i32_0 : i32, i32, i32
  }
  func.func @transform_1(%arg0: i32) -> (i32, i32) {
    %c0_i32 = arith.constant 0 : i32
    %c0_i32_0 = arith.constant 0 : i32
    %c0_i32_1 = arith.constant 0 : i32
    return %c0_i32, %c0_i32_0 : i32, i32
  }
  func.func @transform_2(%arg0: i32) -> (i32, i32) {
    %c0_i32 = arith.constant 0 : i32
    %c0_i32_0 = arith.constant 0 : i32
    %c0_i32_1 = arith.constant 0 : i32
    return %c0_i32, %c0_i32_0 : i32, i32
  }
  func.func @transform_3(%arg0: i32) -> (i32, i32) {
    %c0_i32 = arith.constant 0 : i32
    %c0_i32_0 = arith.constant 0 : i32
    %c0_i32_1 = arith.constant 0 : i32
    return %c0_i32, %c0_i32_0 : i32, i32
  }
  func.func @transform_4(%arg0: i32) -> (i32, i32) {
    %c0_i32 = arith.constant 0 : i32
    %c0_i32_0 = arith.constant 0 : i32
    %c0_i32_1 = arith.constant 0 : i32
    return %c0_i32, %c0_i32_0 : i32, i32
  }
  func.func @transform_5(%arg0: i32) -> (i32, i32) {
    %c0_i32 = arith.constant 0 : i32
    %c0_i32_0 = arith.constant 0 : i32
    %c0_i32_1 = arith.constant 0 : i32
    return %c0_i32, %c0_i32_0 : i32, i32
  }
  func.func @transform_6(%arg0: i32) -> (i32, i32, i32) {
    %c0_i32 = arith.constant 0 : i32
    %c0_i32_0 = arith.constant 0 : i32
    %c0_i32_1 = arith.constant 0 : i32
    return %arg0, %c0_i32, %c0_i32_0 : i32, i32, i32
  }
}

</mosaic_0001>

<bundles_post_ra>
// kernel: tpu_custom_call.1
= control target key start
LH: loop header
LB: loop body
LE: loop exit
PB: predicated region body
PF: predicated region fallthrough
CT: control target
= control target key end

     0   :  { %s1072_s21 = smov 0   ;;  %s1218_s0 = inlined_call_operand.vmem [shape: f32[2,64,16], index: 0, kind: input, shape index: {}]   ;;  %s1219_s1 = inlined_call_operand.vmem [shape: f32[32,64], index: 1, kind: input, shape index: {}]   ;;  %s1220_s2 = inlined_call_operand.vmem [shape: f32[8,32], index: 2, kind: input, shape index: {}]   ;;  %s1221_s3 = inlined_call_operand.vmem [shape: f32[32,8], index: 3, kind: input, shape index: {}]   ;;  %s1222_s4 = inlined_call_operand.vmem [shape: f32[32,1], index: 4, kind: input, shape index: {}]   ;;  %s1223_s5 = inlined_call_operand.vmem [shape: f32[32,1], index: 5, kind: input, shape index: {}]   ;;  %s1224_s6 = inlined_call_operand.vmem [shape: f32[2,32,16], index: 6, kind: output, shape index: {}]  }
   0x1 LB: > { %s890_s22 = sadd.s32 4294967295, %s1032_s21   ;;  %p894_p0 = scmp.ge.s32.totalorder %s1032_s21, 1  ;;  %s1032_s21 = sphi %s1072_s21, %s16_s21  }
   0x2   : > { %p212_p1 = scmp.lt.s32.totalorder %s1032_s21, 3 }
   0x4   : > { %p213_p2 = pnand %p894_p0, %p212_p1 }
   0x5   : > { %p242_p3 = scmp.lt.s32.totalorder (!%p213_p2), %s890_s22, 1 }
   0x6   : > { %216 = sbr.rel (%p213_p2) target bundleno = 1591 (0x637), region = 44 }
   0xb   : > { %v260_v0 = vld [vmem:[%s1219_s1] sm:$0xff]  ;;  %vm264_vm0 = vcmask 523264   ;;  %s1226_s22 = smov (!%p242_p3, %s890_s22), 1  ;;  %v261_v9 = vld [vmem:[%s1219_s1 + $0x8] sm:$0xff]  ;;  %v262_v10 = vld [vmem:[%s1219_s1 + $0x10] sm:$0xff]  ;;  %vm362_vm1 = vcmask 130048  }
   0xc   : > { %965 = vmatprep.mubr.msk.f32.mxu0 %vm264_vm0, %v260_v0  ;;  %s915_s25 = sshll.u32 %s1226_s22, 6  ;;  %v263_v11 = vld [vmem:[%s1219_s1 + $0x18] sm:$0xff]  ;;  %v1034_v20 = vmov 0.0   ;;  %vm1035_vm2 = vmmov 0   ;;  %v1117_v24 = vld [vmem:[%s1220_s2] sm:$0xff]  ;;  %vm376_vm3 = vcmask 261120  }
   0xd   : > { %s246_s28 = scalar_lea.vmem %s1218_s0, %s915_s25  ;;  %971 = vmatprep.subr.mxu1 %v1034_v20  ;;  %979 = vmatprep.mubr.msk.f32.mxu1 %vm1035_vm2, %v1034_v20  ;;  %v451_v26 = vld [vmem:[%s1221_s3] sm:$0xff]  ;;  %vm455_vm4 = vcmask 64512   ;;  %v1036_v27 = vmov 0   ;;  %v1130_v31 = vld [vmem:[%s1221_s3 + $0x8] sm:$0xff]  ;;  %v453_v32 = vld [vmem:[%s1221_s3 + $0x10] sm:$0xff]  ;;  %s916_s15 = sshll.u32 %s1226_s22, 5 }
   0xe   : > { %v259_v1 = vld [vmem:[%s246_s28 + $0x38] sm:$0xff]  ;;  %v258_v2 = vld [vmem:[%s246_s28 + $0x30] sm:$0xff]  ;;  %v257_v3 = vld [vmem:[%s246_s28 + $0x28] sm:$0xff]  ;;  %1023 = vset.pattern.permute.xlu1 %v1036_v27  ;;  %1022 = vset.pattern.permute.xlu0 %v1036_v27  ;;  %s251_s18 = scalar_lea.vmem %s1224_s6, %s916_s15 }
   0xf   : > { %949 = vmatprep.subr.mxu0 %v259_v1  ;;  %v256_v4 = vld [vmem:[%s246_s28 + $0x20] sm:$0xff]  ;;  %v255_v5 = vld [vmem:[%s246_s28 + $0x18] sm:$0xff]  ;;  %v254_v6 = vld [vmem:[%s246_s28 + $0x10] sm:$0xff] }
  0x10   : > { %950 = vmatpush3.msra.mxu0 %v259_v1  ;;  %v253_v7 = vld [vmem:[%s246_s28 + $0x8] sm:$0xff]  ;;  %v252_v8 = vld [vmem:[%s246_s28] sm:$0xff]  ;;  %v1142_v33 = vld [vmem:[%s1221_s3 + $0x18] sm:$0xff] }
  0x11   : > { %951 = vmatprep.subr.mxu0 %v258_v2  ;;  %v776_v54 = vld [vmem:[%s1222_s4 + $0x8] sm:$0xff]  ;;  %v775_v55 = vld [vmem:[%s1222_s4] sm:$0xff]  ;;  %v778_v56 = vld [vmem:[%s1222_s4 + $0x18] sm:$0xff] }
  0x12   : > { %952 = vmatpush3.msra.mxu0 %v258_v2  ;;  %v777_v57 = vld [vmem:[%s1222_s4 + $0x10] sm:$0xff]  ;;  %v804_v58 = vld [vmem:[%s1223_s5 + $0x8] sm:$0xff]  ;;  %v803_v59 = vld [vmem:[%s1223_s5] sm:$0xff] }
  0x13   : > { %953 = vmatprep.subr.mxu0 %v257_v3 }
  0x14   : > { %954 = vmatpush3.msra.mxu0 %v257_v3 }
  0x15   : > { %955 = vmatprep.subr.mxu0 %v256_v4 }
  0x16   : > { %956 = vmatpush3.msra.mxu0 %v256_v4 }
  0x17   : > { %957 = vmatprep.subr.mxu0 %v255_v5 }
  0x18   : > { %958 = vmatpush3.msra.mxu0 %v255_v5 }
  0x19   : > { %959 = vmatprep.subr.mxu0 %v254_v6 }
  0x1a   : > { %960 = vmatpush3.msra.mxu0 %v254_v6 }
  0x1b   : > { %961 = vmatprep.subr.mxu0 %v253_v7 }
  0x1c   : > { %962 = vmatpush3.msra.mxu0 %v253_v7  ;;  %v806_v7 = vld [vmem:[%s1223_s5 + $0x18] sm:$0xff] }
  0x1d   : > { %963 = vmatprep.subr.mxu0 %v252_v8 }
  0x1e   : > { %964 = vmatpush3.msra.mxu0 %v252_v8 }
  0x1f   : > { %966 = vmatmul.mubr.msk.f32.vlgmr.msra.gmra.mxu0 %vm264_vm0, %v261_v9 }
  0x20   : > { %968 = vmatprep.mubr.msk.f32.mxu0 %vm264_vm0, %v262_v10  ;;  %v805_v10 = vld [vmem:[%s1223_s5 + $0x10] sm:$0xff] }
  0x23   : > { %969 = vmatmul.mubr.msk.f32.gmra.mxu0 %vm264_vm0, %v263_v11 }
  0x24   : > { %1003 = vmatprep.mubr.msk.f32.mxu0 %vm455_vm4, %v451_v26 }
  0xdf   : > { %v967_v12 = vpop.f32.mrf.mxu0 }
  0xe0   : > { %v366_v13 = vsel %vm362_vm1, %v967_v12, 0.0 }
  0xe1   : > { %367 = vadd.xlane.f32.xlu1 %v366_v13  ;;  %v1103_v14 = vpop.f32.mrf.mxu0 }
  0xe2   : > { %v363_v16 = vsel %vm362_vm1, %v1103_v14, 0.0 }
  0xe3   : > { %v970_v15 = vpop.f32.mrf.mxu0 }
  0xe4   : > { %v372_v17 = vsel %vm362_vm1, %v970_v15, 0.0 }
  0xe5   : > { %364 = vadd.xlane.f32.xlu1 %v363_v16  ;;  %373 = vadd.xlane.f32.xlu0 %v372_v17  ;;  %v353_v18 = vpop.f32.mrf.mxu0 }
  0xe6   : > { %v369_v19 = vsel %vm362_vm1, %v353_v18, 0.0 }
  0xe9   : > { %370 = vadd.xlane.f32.xlu0 %v369_v19 }
 0x16a   : > { %v368_v22 = vpop.xlane.xlu1 %367 }
 0x16e   : > { %v374_v21 = vpop.xlane.xlu0 %373  ;;  %v365_v25 = vpop.xlane.xlu1 %364 }
 0x16f   : > { %972 = vmatpush3.msra.mxu1 %v374_v21 }
 0x170   : > { %973 = vmatprep.subr.mxu1 %v1034_v20 }
 0x172   : > { %v371_v23 = vpop.xlane.xlu0 %370 }
 0x173   : > { %974 = vmatpush3.msra.mxu1 %v371_v23 }
 0x174   : > { %975 = vmatprep.subr.mxu1 %v1034_v20 }
 0x175   : > { %976 = vmatpush3.msra.mxu1 %v368_v22 }
 0x176   : > { %977 = vmatprep.subr.mxu1 %v1034_v20 }
 0x177   : > { %978 = vmatpush3.msra.mxu1 %v365_v25 }
 0x178   : > { %980 = vmatmul.mubr.msk.f32.vlgmr.msra.gmra.mxu1 %vm376_vm3, %v1117_v24 }
 0x179   : > { %984 = vmatprep.mubr.msk.f32.mxu1 %vm455_vm4, %v451_v26 }
 0x238   : > { %v446_v28 = vpop.f32.mrf.mxu1 }
 0x239   : > { %v450_v29 = vmul.f32 0.015625, %v446_v28 }
 0x23a   : > { %v981_v30 = vpop.f32.mrf.mxu1 }
 0x23b   : > { %982 = vmatprep.subr.mxu1 %v450_v29 }
 0x23c   : > { %983 = vmatpush3.msra.mxu1 %v450_v29 }
 0x23d   : > { %985 = vmatmul.mubr.msk.f32.vlgmr.msra.gmra.mxu1 %vm455_vm4, %v1130_v31  ;;  %990 = vmatprep.subr.mxu1 %v1034_v20 }
 0x23e   : > { %987 = vmatprep.mubr.msk.f32.mxu1 %vm455_vm4, %v453_v32 }
 0x241   : > { %988 = vmatmul.mubr.msk.f32.gmra.mxu1 %vm455_vm4, %v1142_v33 }
 0x242   : > { %998 = vmatprep.mubr.msk.f32.mxu1 %vm1035_vm2, %v1034_v20 }
 0x2fd   : > { %v986_v34 = vpop.f32.mrf.mxu1 }
 0x2fe   : > { %560 = vperm.xlu1 %1023, %v986_v34  }
 0x2ff   : > { %v534_v35 = vpop.f32.mrf.mxu1 }
 0x301   : > { %v989_v36 = vpop.f32.mrf.mxu1 }
 0x302   : > { %570 = vperm.xlu0 %1022, %v989_v36  }
 0x303   : > { %v544_v37 = vpop.f32.mrf.mxu1 }
 0x304   : > { %565 = vperm.xlu1 %1023, %v544_v37  }
 0x308   : > { %555 = vperm.xlu1 %1023, %v534_v35  }
 0x379   : > { %v561_v38 = vpop.permute.xlu1 %560 }
 0x37a   : > { %v1148_v40 = vsub.f32 %v967_v12, %v561_v38 }
 0x37c   : > { %v578_v47 = vmul.f32 %v1148_v40, %v1148_v40 }
 0x37d   : > { %v571_v39 = vpop.permute.xlu0 %570 }
 0x37e   : > { %v1150_v41 = vsub.f32 %v970_v15, %v571_v39  ;;  %v584_v51 = vsel %vm362_vm1, %v578_v47, 0.0 }
 0x37f   : > { %v566_v42 = vpop.permute.xlu1 %565 }
 0x380   : > { %v1152_v43 = vsub.f32 %v353_v18, %v566_v42  ;;  %v580_v44 = vmul.f32 %v1150_v41, %v1150_v41 }
 0x382   : > { %v590_v45 = vsel %vm362_vm1, %v580_v44, 0.0  ;;  %v579_v46 = vmul.f32 %v1152_v43, %v1152_v43 }
 0x383   : > { %591 = vadd.xlane.f32.xlu1 %v590_v45  ;;  %v556_v48 = vpop.permute.xlu1 %555 }
 0x384   : > { %v1162_v49 = vsub.f32 %v1103_v14, %v556_v48  ;;  %v587_v50 = vsel %vm362_vm1, %v579_v46, 0.0 }
 0x385   : > { %588 = vadd.xlane.f32.xlu0 %v587_v50 }
 0x386   : > { %v577_v52 = vmul.f32 %v1162_v49, %v1162_v49 }
 0x387   : > { %585 = vadd.xlane.f32.xlu1 %v584_v51 }
 0x388   : > { %v581_v53 = vsel %vm362_vm1, %v577_v52, 0.0 }
 0x38b   : > { %582 = vadd.xlane.f32.xlu1 %v581_v53 }
 0x39b   : > { %786 = vperm.xlu0 %1022, %v776_v54  }
 0x39c   : > { %781 = vperm.xlu1 %1023, %v775_v55  }
 0x39f   : > { %796 = vperm.xlu0 %1022, %v778_v56  }
 0x3a0   : > { %791 = vperm.xlu1 %1023, %v777_v57  }
 0x3a3   : > { %814 = vperm.xlu0 %1022, %v804_v58  }
 0x3a4   : > { %809 = vperm.xlu1 %1023, %v803_v59  }
 0x40c   : > { %v592_v60 = vpop.xlane.xlu1 %591 }
 0x40d   : > { %991 = vmatpush3.msra.mxu1 %v592_v60 }
 0x40e   : > { %v589_v61 = vpop.xlane.xlu0 %588  ;;  %992 = vmatprep.subr.mxu1 %v1034_v20 }
 0x40f   : > { %993 = vmatpush3.msra.mxu1 %v589_v61 }
 0x410   : > { %994 = vmatprep.subr.mxu1 %v1034_v20  ;;  %v586_v62 = vpop.xlane.xlu1 %585 }
 0x411   : > { %995 = vmatpush3.msra.mxu1 %v586_v62 }
 0x412   : > { %996 = vmatprep.subr.mxu1 %v1034_v20 }
 0x414   : > { %v583_v63 = vpop.xlane.xlu1 %582 }
 0x415   : > { %997 = vmatpush3.msra.mxu1 %v583_v63 }
 0x416   : > { %999 = vmatmul.mubr.msk.f32.vlgmr.msra.gmra.mxu1 %vm376_vm3, %v1117_v24  ;;  %v787_v11 = vpop.permute.xlu0 %786 }
 0x417   : > { %1006 = vmatprep.mubr.msk.f32.mxu1 %vm455_vm4, %v453_v32 }
 0x418   : > { %v782_v12 = vpop.permute.xlu1 %781 }
 0x41a   : > { %v797_v13 = vpop.permute.xlu0 %796 }
 0x41c   : > { %v792_v14 = vpop.permute.xlu1 %791 }
 0x41e   : > { %v815_v15 = vpop.permute.xlu0 %814 }
 0x420   : > { %v810_v16 = vpop.permute.xlu1 %809 }
 0x4d6   : > { %v659_v0 = vpop.f32.mrf.mxu1 }
 0x4d7   : > { %v663_v1 = vmul.f32 0.015625, %v659_v0 }
 0x4d8   : > { %v1000_v2 = vpop.f32.mrf.mxu1 }
 0x4d9   : > { %v664_v3 = vadd.f32 1e-05, %v663_v1 }
 0x4db   : > { %1024 = vrsqrt.f32 %v664_v3 }
 0x4e8   : > { %v1025_v4 = vpop.eup %1024 }
 0x4e9   : > { %1001 = vmatprep.subr.mxu0 %v1025_v4  ;;  %1009 = vmatprep.subr.mxu1 %v1025_v4 }
 0x4ea   : > { %1002 = vmatpush3.msra.mxu0 %v1025_v4  ;;  %1010 = vmatpush3.msra.mxu1 %v1025_v4 }
 0x4eb   : > { %1004 = vmatmul.mubr.msk.f32.vlgmr.msra.gmra.mxu0 %vm455_vm4, %v1130_v31  ;;  %1007 = vmatmul.mubr.msk.f32.vlgmr.msra.gmra.mxu1 %vm455_vm4, %v1142_v33 }
 0x5ab   : > { %v1005_v5 = vpop.f32.mrf.mxu0  ;;  %v1008_v6 = vpop.f32.mrf.mxu1 }
 0x5ac   : > { %758 = vperm.xlu0 %1022, %v1005_v5   ;;  %768 = vperm.xlu1 %1023, %v1008_v6  }
 0x5ad   : > { %v732_v8 = vpop.f32.mrf.mxu0  ;;  %v742_v9 = vpop.f32.mrf.mxu1 }
 0x5b0   : > { %824 = vperm.xlu0 %1022, %v806_v7   ;;  %753 = vperm.xlu1 %1023, %v732_v8  }
 0x5b4   : > { %763 = vperm.xlu1 %1023, %v742_v9  }
 0x5b8   : > { %819 = vperm.xlu1 %1023, %v805_v10  }
 0x627   : > { %v759_v17 = vpop.permute.xlu0 %758  ;;  %v769_v18 = vpop.permute.xlu1 %768 }
 0x628   : > { %v772_v19 = vmul.f32 %v759_v17, %v1148_v40  ;;  %v774_v20 = vmul.f32 %v769_v18, %v1150_v41 }
 0x62a   : > { %v800_v21 = vmul.f32 %v787_v11, %v772_v19  ;;  %v802_v22 = vmul.f32 %v797_v13, %v774_v20 }
 0x62b   : > { %v825_v23 = vpop.permute.xlu0 %824  ;;  %v754_v24 = vpop.permute.xlu1 %753 }
 0x62c   : > { %v828_v25 = vadd.f32 %v815_v15, %v800_v21  ;;  %v830_v26 = vadd.f32 %v825_v23, %v802_v22  ;;  %v771_v27 = vmul.f32 %v754_v24, %v1162_v49 }
 0x62e   : > { %832 = vst.msk [vmem:[%s251_s18 + $0x8] sm:$0xff] %vm362_vm1, %v828_v25  ;;  %834 = vst.msk [vmem:[%s251_s18 + $0x18] sm:$0xff] %vm362_vm1, %v830_v26  ;;  %v799_v28 = vmul.f32 %v782_v12, %v771_v27 }
 0x62f   : > { %v764_v29 = vpop.permute.xlu1 %763 }
 0x630   : > { %v827_v30 = vadd.f32 %v810_v16, %v799_v28  ;;  %v773_v31 = vmul.f32 %v764_v29, %v1152_v43 }
 0x632   : > { %831 = vst.msk [vmem:[%s251_s18] sm:$0xff] %vm362_vm1, %v827_v30  ;;  %v801_v32 = vmul.f32 %v792_v14, %v773_v31 }
 0x633   : > { %v820_v33 = vpop.permute.xlu1 %819 }
 0x634   : > { %v829_v34 = vadd.f32 %v820_v33, %v801_v32 }
 0x636   : > { %833 = vst.msk [vmem:[%s251_s18 + $0x10] sm:$0xff] %vm362_vm1, %v829_v34 }
 0x637 PF: > { %s16_s21 = sadd.s32 1, %s1032_s21  }
 0x638   : > { %p13_p4 = scmp.ge.s32.totalorder %s16_s21, 4  }
 0x63a   :  { %15 = sbr.rel (!%p13_p4) target bundleno = 1 (0x1), region = 74 }

</bundles_post_ra>
